<compile_context>
chip_gen: v7x
topology: tpu7x:2x2x1
jax: 0.10.0
libtpu: 0.0.40
codegen_flags: <defaults>
</compile_context>

<pallas_src>
import functools

import jax
import jax.numpy as jnp
from jax.experimental import pallas as pl
from jax.experimental.pallas import tpu as pltpu


# ----------------------------------------------------------------------------
# One-time probe of the hardware lane-rotate direction convention.
# pltpu.roll is expected to match np.roll (element i -> i + shift); this guard
# keeps the kernel correct even if the lowering uses the opposite convention.
# ----------------------------------------------------------------------------
_ROLL_IS_NUMPY = None


def _roll_matches_numpy():
    global _ROLL_IS_NUMPY
    if _ROLL_IS_NUMPY is None:
        def k(x_ref, o_ref):
            o_ref[...] = pltpu.roll(x_ref[...], shift=1, axis=1)

        x = jnp.broadcast_to(jnp.arange(128, dtype=jnp.float32), (8, 128))
        y = pl.pallas_call(
            k, out_shape=jax.ShapeDtypeStruct((8, 128), jnp.float32))(x)
        _ROLL_IS_NUMPY = (float(y[0, 1]) == 0.0)
    return _ROLL_IS_NUMPY


def conductor_kernel(z_ref, wtoh_ref, btoh_ref, init_ref, wih_ref, whh_ref,
                     b_ref, out_ref, *, num_layers, num_tracks, hidden_size,
                     roll_numpy):
    """to_h + embedding init + unrolled (tracks x layers) LSTM, all in VMEM."""
    f32, bf16 = jnp.float32, jnp.bfloat16
    H = hidden_size
    L, T = num_layers, num_tracks
    G = 4 * H                       # gate width (lane-dense: G == 128 at H=32)
    B = z_ref.shape[0]

    def bring_to_block0(v, k):
        # Rotate lanes so gate block k (lanes [k*H, (k+1)*H)) lands on block 0.
        s = (G - k * H) % G if roll_numpy else (k * H) % G
        return pltpu.roll(v, shift=s, axis=1) if s else v

    def send_from_block0(v, k):
        # Rotate lanes so block 0 of v lands on block k.
        s = (k * H) % G if roll_numpy else (G - k * H) % G
        return pltpu.roll(v, shift=s, axis=1) if s else v

    # ---- hoisted lane constants (sigmoid on i/f/o lanes, tanh on g lanes) ---
    lane = jax.lax.broadcasted_iota(jnp.int32, (B, G), 1)
    is_g = jnp.logical_and(lane >= 2 * H, lane < 3 * H)
    scale = jnp.where(is_g, f32(1.0), f32(0.5))
    shift = jnp.where(is_g, f32(0.0), f32(0.5))

    # ---- hoisted loop-invariant broadcast biases ----------------------------
    bias = [jnp.broadcast_to(b_ref[l], (B, G)) for l in range(L)]
    # NOTE: the padded (G, G) weights are deliberately NOT hoisted into SSA
    # values (a static Python `for` does not bound live ranges; at larger H they
    # would pin / spill the vreg file).  They are read from VMEM per use below;
    # those loads are loop-invariant and sit off the recurrence critical path.

    # ---- to_h: one matmul producing per-layer full-width (B, G) init states -
    # The packed to_h weight puts layer l's real columns at lanes
    # [l*G, l*G + H), so the per-layer split is a vreg-aligned slice.
    toh = jnp.tanh(
        jnp.dot(z_ref[...].astype(bf16), wtoh_ref[...],
                preferred_element_type=f32)
        + btoh_ref[...])                                           # (B, L*G)
    h = [toh[:, l * G:(l + 1) * G] for l in range(L)]              # real lanes [0, H), rest 0
    c = [jnp.zeros((B, G), f32) for _ in range(L)]

    # ---- init_step embedding, pre-padded to (1, G) with zeros beyond lane H -
    x = jnp.broadcast_to(init_ref[...], (B, G))

    # ---- unrolled num_tracks x num_layers LSTM recurrence ---------------------
    # State convention: x / h[l] / c[l] are full-width (B, G) vregs whose real
    # data lives in lane block 0; the remaining lanes carry bounded garbage that
    # is annihilated by the zero rows [H, G) of the padded weights, so no
    # per-cell concat or lane slice is ever needed.
    # TODO(synk): nn.LSTM inter-layer dropout is training-mode only; eval fwd.
    # TODO(synk): pltpu.matmul_push_rhs/acc_lhs/pop could keep each layer's
    # weights resident in the MXU across tracks (chip-dependent; not portable).
    outs = []
    for _ in range(T):
        for l in range(L):
            x_bf = x.astype(bf16)
            h_bf = h[l].astype(bf16)
            # Two co-issuing MXU matmuls (gate column order is torch's i,f,g,o).
            gates = (jnp.dot(x_bf, wih_ref[l], preferred_element_type=f32)
                     + jnp.dot(h_bf, whh_ref[l], preferred_element_type=f32)
                     + bias[l])                                    # (B, G) f32
            # sigmoid(v) = 0.5*tanh(0.5 v)+0.5 on i/f/o lanes, tanh on g lanes:
            # a single full-width EUP pass.
            act = jnp.tanh(gates * scale) * scale + shift
            # Align f/g/o onto lane block 0 with XLU rotates (no strided slices).
            f_al = bring_to_block0(act, 1)
            g_al = bring_to_block0(act, 2)
            o_al = bring_to_block0(act, 3)
            c[l] = f_al * c[l] + act * g_al        # act carries i on block 0
            h[l] = o_al * jnp.tanh(c[l])
            x = h[l]
        outs.append(x)

    # ---- single lane-dense (B, T*H) store (one-time epilogue) ----------------
    if T * H == G:
        mask0 = (lane < H).astype(f32)
        packed = outs[0] * mask0
        for t in range(1, T):
            packed = packed + send_from_block0(outs[t] * mask0, t)
        out_ref[...] = packed.astype(out_ref.dtype)
    else:
        out_ref[...] = jnp.concatenate(
            [o[:, :H] for o in outs], axis=1).astype(out_ref.dtype)


@functools.partial(jax.jit,
                   static_argnames=("num_layers", "num_tracks", "hidden_size",
                                    "batch_blocks", "roll_numpy"))
def _conductor_pallas(z, w_toh_blk, b_toh_blk, init_pad, w_ih_pad, w_hh_pad, b,
                      *, num_layers, num_tracks, hidden_size, batch_blocks,
                      roll_numpy):
    B = z.shape[0]
    H, L, T, G = hidden_size, num_layers, num_tracks, 4 * hidden_size
    assert B % batch_blocks == 0
    Bb = B // batch_blocks
    # A batch grid only pays off on 2-TensorCore parts (v7x) with B >= 16;
    # keep every per-core block sublane-dense (>= 8 rows).
    assert batch_blocks == 1 or Bb >= 8, "per-core batch block must keep Bb >= 8"

    kernel = functools.partial(conductor_kernel, num_layers=L, num_tracks=T,
                               hidden_size=H, roll_numpy=roll_numpy)

    flops = 2 * B * (T * L * 2 * H * 4 * H + H * L * H)
    transcendentals = B * (T * L * 5 * H + L * H)
    bytes_accessed = (4 * z.size
                      + 2 * (w_toh_blk.size + w_ih_pad.size + w_hh_pad.size)
                      + 4 * (b_toh_blk.size + init_pad.size + b.size)
                      + 4 * B * T * H)

    return pl.pallas_call(
        kernel,
        out_shape=jax.ShapeDtypeStruct((B, T * H), jnp.float32),
        grid=(batch_blocks,),
        in_specs=[
            pl.BlockSpec((Bb, H), lambda i: (i, 0)),              # z (blocked on batch)
            pl.BlockSpec((H, L * G), lambda i: (0, 0)),           # packed to_h weight
            pl.BlockSpec((1, L * G), lambda i: (0, 0)),           # packed to_h bias
            pl.BlockSpec((1, G), lambda i: (0, 0)),               # padded init embedding
            pl.BlockSpec((L, G, G), lambda i: (0, 0, 0)),         # padded W_ih
            pl.BlockSpec((L, G, G), lambda i: (0, 0, 0)),         # padded W_hh
            pl.BlockSpec((L, 1, G), lambda i: (0, 0, 0)),         # fused LSTM bias
        ],
        out_specs=pl.BlockSpec((Bb, T * H), lambda i: (i, 0)),
        # For large-H reuse on v7x: invariant weight specs can be single-buffered
        # (pipeline_mode) and vmem_limit_bytes raised; irrelevant at these sizes.
        compiler_params=pltpu.CompilerParams(
            dimension_semantics=("parallel",)),
        cost_estimate=pl.CostEstimate(flops=int(flops),
                                      transcendentals=int(transcendentals),
                                      bytes_accessed=int(bytes_accessed)),
    )(z, w_toh_blk, b_toh_blk, init_pad, w_ih_pad, w_hh_pad, b)


def conductor_forward(z, packed, num_layers, num_tracks, hidden_size,
                      batch_blocks=1):
    out = _conductor_pallas(z, packed["w_toh_blk"], packed["b_toh_blk"],
                            packed["init_pad"], packed["w_ih_pad"],
                            packed["w_hh_pad"], packed["b"],
                            num_layers=num_layers, num_tracks=num_tracks,
                            hidden_size=hidden_size, batch_blocks=batch_blocks,
                            roll_numpy=_roll_matches_numpy())
    H = hidden_size
    return [out[:, t * H:(t + 1) * H] for t in range(num_tracks)]


def init_params(key, hidden_size, num_layers):
    """Logical parameters mimicking PyTorch's default init (eval forward)."""
    H, L = hidden_size, num_layers
    k = float(H) ** -0.5
    keys = jax.random.split(key, 7)
    w_toh = jax.random.uniform(keys[0], (H, L * H), jnp.float32, -k, k)
    b_toh = jax.random.uniform(keys[1], (L * H,), jnp.float32, -k, k)
    init_emb = jax.random.normal(keys[2], (1, H), jnp.float32)
    # torch.nn.LSTM weights transposed to (in_dim, 4H), gate order i, f, g, o.
    w_ih = jax.random.uniform(keys[3], (L, H, 4 * H), jnp.float32, -k, k)
    w_hh = jax.random.uniform(keys[4], (L, H, 4 * H), jnp.float32, -k, k)
    b_ih = jax.random.uniform(keys[5], (L, 4 * H), jnp.float32, -k, k)
    b_hh = jax.random.uniform(keys[6], (L, 4 * H), jnp.float32, -k, k)
    return {"w_toh": w_toh, "b_toh": b_toh, "init_emb": init_emb,
            "w_ih": w_ih, "w_hh": w_hh, "b": b_ih + b_hh}


def pack_params(params, hidden_size, num_layers):
    """One-time host-side packing into the kernel's lane layout.

    * LSTM weights -> (L, 4H, 4H) bf16 with the real (H, 4H) block in rows
      [0, H) and zeros elsewhere, so the full-width state can feed the MXU
      directly (garbage lanes hit zero rows, no per-cell LHS slice).
    * to_h weight -> (H, L*4H) bf16 with layer l's real columns at lanes
      [l*4H, l*4H + H), so the per-layer init split is a vreg-aligned slice.
    * init embedding -> (1, 4H) zero-padded.
    """
    H, L = hidden_size, num_layers
    G = 4 * H
    w_toh = params["w_toh"].reshape(H, L, H)
    w_toh_blk = (jnp.zeros((H, L, G), jnp.float32).at[:, :, :H].set(w_toh)
                 .reshape(H, L * G).astype(jnp.bfloat16))
    b_toh = params["b_toh"].reshape(L, H)
    b_toh_blk = (jnp.zeros((L, G), jnp.float32).at[:, :H].set(b_toh)
                 .reshape(1, L * G))
    init_pad = jnp.zeros((1, G), jnp.float32).at[:, :H].set(params["init_emb"])
    w_ih_pad = (jnp.zeros((L, G, G), jnp.float32).at[:, :H, :]
                .set(params["w_ih"]).astype(jnp.bfloat16))
    w_hh_pad = (jnp.zeros((L, G, G), jnp.float32).at[:, :H, :]
                .set(params["w_hh"]).astype(jnp.bfloat16))
    b = params["b"][:, None, :]                                   # (L, 1, 4H) f32
    return {"w_toh_blk": w_toh_blk, "b_toh_blk": b_toh_blk,
            "init_pad": init_pad, "w_ih_pad": w_ih_pad,
            "w_hh_pad": w_hh_pad, "b": b}


def conductor_ref(z, params, num_layers, num_tracks):
    """Pure-JAX reference matching the PyTorch forward (eval mode)."""
    B, H = z.shape
    L, T = num_layers, num_tracks
    bf16 = jnp.bfloat16
    toh = jnp.tanh(jnp.dot(z.astype(bf16), params["w_toh"].astype(bf16),
                           preferred_element_type=jnp.float32)
                   + params["b_toh"])
    h = [toh[:, l * H:(l + 1) * H] for l in range(L)]
    c = [jnp.zeros((B, H), jnp.float32) for _ in range(L)]
    x = jnp.broadcast_to(params["init_emb"], (B, H))
    w_ih = params["w_ih"].astype(bf16)
    w_hh = params["w_hh"].astype(bf16)
    outs = []
    for _ in range(T):
        for l in range(L):
            gates = (jnp.dot(x.astype(bf16), w_ih[l],
                             preferred_element_type=jnp.float32)
                     + jnp.dot(h[l].astype(bf16), w_hh[l],
                               preferred_element_type=jnp.float32)
                     + params["b"][l])
            i_g = jax.nn.sigmoid(gates[:, :H])
            f_g = jax.nn.sigmoid(gates[:, H:2 * H])
            g_g = jnp.tanh(gates[:, 2 * H:3 * H])
            o_g = jax.nn.sigmoid(gates[:, 3 * H:])
            c[l] = f_g * c[l] + i_g * g_g
            h[l] = o_g * jnp.tanh(c[l])
            x = h[l]
        outs.append(x)
    return outs


if __name__ == "__main__":
    hidden_size = 32
    num_layers = 2
    num_tracks = 4      # T*H = 128 -> lane-dense single output store + roll-pack
    batch = 8

    key = jax.random.PRNGKey(0)
    kz, kp, kz2 = jax.random.split(key, 3)
    z = jax.random.normal(kz, (batch, hidden_size), jnp.float32)
    params = init_params(kp, hidden_size, num_layers)
    packed = pack_params(params, hidden_size, num_layers)

    outs = conductor_forward(z, packed, num_layers, num_tracks, hidden_size)
    outs = [jax.block_until_ready(o) for o in outs]
    refs = conductor_ref(z, params, num_layers, num_tracks)
    for o, r in zip(outs, refs):
        assert o.shape == (batch, hidden_size)
        assert jnp.allclose(o, r, atol=5e-3, rtol=5e-3), "mismatch vs reference"

    # Two-TensorCore-style split (v7x): only with B >= 16 so each block keeps a
    # sublane-dense (Bb >= 8) batch; single-TC chips should stay batch_blocks=1.
    z2 = jax.random.normal(kz2, (16, hidden_size), jnp.float32)
    outs2 = conductor_forward(z2, packed, num_layers, num_tracks, hidden_size,
                              batch_blocks=2)
    outs2 = [jax.block_until_ready(o) for o in outs2]
    refs2 = conductor_ref(z2, params, num_layers, num_tracks)
    for o, r in zip(outs2, refs2):
        assert o.shape == (16, hidden_size)
        assert jnp.allclose(o, r, atol=5e-3, rtol=5e-3), "mismatch vs reference (grid)"

    print("KERNEL_OK")
</pallas_src>

<mosaic_0001>
module attributes {stable_mosaic.version = 11 : i64} {
  func.func @k(%arg0: memref<8x128xf32, #tpu.memory_space<vmem>>, %arg1: memref<8x128xf32, #tpu.memory_space<vmem>>) attributes {dimension_semantics = [], scalar_prefetch = 0 : i64, scratch_operands = 0 : i64, tpu.core_type = #tpu.core_type<tc>} {
    %c0 = arith.constant 0 : index
    %c0_0 = arith.constant 0 : index
    %0 = vector.load %arg0[%c0, %c0_0] : memref<8x128xf32, #tpu.memory_space<vmem>>, vector<8x128xf32>
    %c1_i32 = arith.constant 1 : i32
    %1 = tpu.dynamic_rotate %0 by %c1_i32 dim 1 : vector<8x128xf32>, i32 -> vector<8x128xf32>
    %c0_1 = arith.constant 0 : index
    %c0_2 = arith.constant 0 : index
    %2 = vector.load %arg1[%c0_1, %c0_2] : memref<8x128xf32, #tpu.memory_space<vmem>>, vector<8x128xf32>
    tpu.vector_store %arg1[%c0_1, %c0_2], %1 {strides = array<i32>} : memref<8x128xf32, #tpu.memory_space<vmem>>, vector<8x128xf32>,
    return
  }
}

</mosaic_0001>

<bundles_post_ra>
// kernel: tpu_custom_call.1
= control target key start
LH: loop header
LB: loop body
LE: loop exit
PB: predicated region body
PF: predicated region fallthrough
CT: control target
= control target key end

     0   :  { %6 = vsyncpa [#allocation3], 0  ;;  %s128_s0 = inlined_call_operand.hbm [shape: f32[8,128], index: 0, kind: input, shape index: {}]   ;;  %s129_s1 = inlined_call_operand.hbm [shape: f32[8,128], index: 1, kind: output, shape index: {}]  }
   0x1   :  { %7 = vsyncpa [#allocation4], 0  ;;  %s91_s6 = smov [#allocation2]   ;;  %s43_s10 = scalar_lea.hbm %s128_s0, 128 }
   0x2   :  { %s14_s7 = sshll.u32 %s91_s6, 4  ;;  %p44_p0 = scmp.ne.s32.totalorder %s128_s0, %s43_s10  ;;  %s15_s7 = int_to_ptr.vmem [resolvable:$true] %s14_s7 }
   0x3   :  { %p47_p1 = scmp.lt.u32.totalorder %s43_s10, %s128_s0 }
   0x5   :  { %p49_p2 = pnand %p47_p1, %p44_p0 }
   0x7   :  { %52 = shalt.err (!%p49_p2)
}
   0x8   :  { %s53_s15 = scalar_lea.vmem %s15_s7, 128  ;;  %p58_p4 = scmp.lt.s32.totalorder %s15_s7, %s15_s7 }
   0x9   :  { %p54_p3 = scmp.ne.s32.totalorder %s15_s7, %s53_s15  ;;  %p59_p5 = scmp.lt.s32.totalorder %s53_s15, %s53_s15 }
   0xb   :  { %p60_p6 = por %p59_p5, %p58_p4 }
   0xd   :  { %p61_p7 = pnand %p60_p6, %p54_p3 }
   0xf   :  { %64 = shalt.err (!%p61_p7)
}
  0x10   :  { %17 = dma.hbm_to_vmem [thread:$0]  %s128_s0, 128, %s15_s7, [#allocation3]  }
  0x11   :  { %87 = dma.done.wait [#allocation3], 128  }
  0x12   :  { %88 = vsyncadd [#allocation3], 4294967168  ;;  %v21_v0 = vld [vmem:[#allocation2] sm:$0xff]  ;;  %s92_s18 = smov 1   ;;  %s93_s19 = smov [#allocation5]  }
  0x13   :  { %22 = vrot.lane.b32.xlu0 %v21_v0, %s92_s18  ;;  %s31_s20 = sshll.u32 %s93_s19, 4  ;;  %s32_s20 = int_to_ptr.vmem [resolvable:$true] %s31_s20 }
  0x14   :  { %s65_s21 = scalar_lea.vmem %s32_s20, 128  ;;  %p70_p9 = scmp.lt.s32.totalorder %s32_s20, %s32_s20 }
  0x15   :  { %p66_p8 = scmp.ne.s32.totalorder %s32_s20, %s65_s21  ;;  %p71_p10 = scmp.lt.s32.totalorder %s65_s21, %s65_s21 }
  0x17   :  { %p72_p11 = por %p71_p10, %p70_p9 }
  0x19   :  { %p73_p12 = pnand %p72_p11, %p66_p8 }
  0x85   :  { %v23_v1 = vpop.permute.xlu0 %22 }
  0x86   :  { %24 = vst [vmem:[#allocation5] sm:$0xff] %v23_v1 }
  0x87   :  { %76 = shalt.err (!%p73_p12)
}
  0x88   :  { %s77_s0 = scalar_lea.hbm %s129_s1, 128 }
  0x89   :  { %p78_p13 = scmp.ne.s32.totalorder %s129_s1, %s77_s0  ;;  %p81_p0 = scmp.lt.u32.totalorder %s77_s0, %s129_s1 }
  0x8b   :  { %p83_p1 = pnand %p81_p0, %p78_p13 }
  0x8d   :  { %86 = shalt.err (!%p83_p1)
}
  0x8e   :  { %34 = dma.vmem_to_hbm [thread:$0]  %s32_s20, 128, %s129_s1, [#allocation4]  }
  0x8f   :  { %89 = dma.done.wait [#allocation4], 128  }
  0x90   :  { %90 = vsyncadd [#allocation4], 4294967168 }
  0x91   :  { %38 = vsyncpa [#allocation3], 1 }
  0x92   :  { %39 = vsyncpa [#allocation4], 1 }

</bundles_post_ra>
